<compile_context>
chip_gen: v6e
topology: v6e:2x2x1
jax: 0.10.0
libtpu: 0.0.40
codegen_flags: <defaults>
</compile_context>

<pallas_src>
import functools
from typing import NamedTuple

import jax
import jax.numpy as jnp
from jax.experimental import pallas as pl
from jax.experimental.pallas import tpu as pltpu


_VMEM_LIMIT_BYTES = 48 * 1024 * 1024  # safe on v7x (64 MiB physical VMEM)


def _round_up(x: int, m: int) -> int:
    return (x + m - 1) // m * m


def _detect_lane_align() -> int:
    """256-aligned tiles feed v6e/v7x's 2x256 MXU; 128 is native on v5e/older."""
    try:
        kind = jax.devices()[0].device_kind.lower()
    except Exception:
        return 128
    return 256 if ("v6" in kind or "v7" in kind) else 128


# ---------------------------------------------------------------------------
# Kernels
# ---------------------------------------------------------------------------
def _linear_fullk_kernel(x_ref, w_ref, b_ref, o_ref):
    """Whole reduction in one block: out = x @ w + b (f32 accumulation)."""
    acc = jnp.dot(x_ref[...], w_ref[...], preferred_element_type=jnp.float32)
    o_ref[...] = (acc + b_ref[...].astype(jnp.float32)).astype(o_ref.dtype)


def _linear_ktiled_kernel(x_ref, w_ref, b_ref, o_ref, acc_ref):
    """K-tiled reduction with a resident f32 VMEM accumulator."""
    k = pl.program_id(2)

    @pl.when(k == 0)
    def _():
        acc_ref[...] = jnp.zeros_like(acc_ref)

    acc_ref[...] += jnp.dot(
        x_ref[...], w_ref[...], preferred_element_type=jnp.float32
    )

    @pl.when(k == pl.num_programs(2) - 1)
    def _():
        o_ref[...] = (acc_ref[...] + b_ref[...].astype(jnp.float32)).astype(
            o_ref.dtype
        )


# ---------------------------------------------------------------------------
# Wrapper
# ---------------------------------------------------------------------------
class _Config(NamedTuple):
    In: int
    Out: int
    Kp: int
    Np: int
    tn: int
    tk: int
    full_k: bool


def _pallas_linear(x, wp, bp, *, cfg: _Config):
    B, In = x.shape
    dtype = x.dtype
    Kp, Np = cfg.Kp, cfg.Np

    # ---- M tiling (batch-dependent) ---------------------------------------
    if B <= 512:
        tm, Mp = B, B  # single full-M tile; no padding, no extra weight passes
    else:
        tm = 512 if B >= 1024 else 256
        Mp = _round_up(B, tm)

    xq = x
    if (Mp, Kp) != (B, In):
        # Only x is ever padded per call (M, and K only in the rare fallback).
        xq = jnp.pad(x, ((0, Mp - B), (0, Kp - In)))

    # ---- ensure >=2 tiles on a "parallel" axis for v7x's 2 TensorCores -----
    tn = cfg.tn
    if Mp // tm == 1 and Np // tn == 1:
        half = tn // 2
        if half >= 128 and half % 128 == 0 and Np % half == 0:
            tn = half

    m_tiles, n_tiles = Mp // tm, Np // tn

    if cfg.full_k:
        out_padded = pl.pallas_call(
            _linear_fullk_kernel,
            out_shape=jax.ShapeDtypeStruct((Mp, Np), dtype),
            grid_spec=pl.GridSpec(
                grid=(m_tiles, n_tiles),
                in_specs=[
                    pl.BlockSpec((tm, Kp), lambda i, j: (i, 0)),
                    pl.BlockSpec((Kp, tn), lambda i, j: (0, j)),
                    pl.BlockSpec((1, tn), lambda i, j: (0, j)),
                ],
                out_specs=pl.BlockSpec((tm, tn), lambda i, j: (i, j)),
            ),
            compiler_params=pltpu.CompilerParams(
                dimension_semantics=("parallel", "parallel"),
                vmem_limit_bytes=_VMEM_LIMIT_BYTES,
            ),
        )(xq, wp, bp)
    else:
        tk = cfg.tk
        k_tiles = Kp // tk
        # TODO(synk): if the K loop is still DMA-exposed for very large heads,
        # add pipeline_mode=pl.Buffered(3) on the weight BlockSpec only.
        out_padded = pl.pallas_call(
            _linear_ktiled_kernel,
            out_shape=jax.ShapeDtypeStruct((Mp, Np), dtype),
            grid_spec=pl.GridSpec(
                grid=(m_tiles, n_tiles, k_tiles),
                in_specs=[
                    pl.BlockSpec((tm, tk), lambda i, j, k: (i, k)),
                    pl.BlockSpec((tk, tn), lambda i, j, k: (k, j)),
                    pl.BlockSpec((1, tn), lambda i, j, k: (0, j)),
                ],
                out_specs=pl.BlockSpec((tm, tn), lambda i, j, k: (i, j)),
                scratch_shapes=[pltpu.VMEM((tm, tn), jnp.float32)],
            ),
            compiler_params=pltpu.CompilerParams(
                dimension_semantics=("parallel", "parallel", "arbitrary"),
                vmem_limit_bytes=_VMEM_LIMIT_BYTES,
            ),
        )(xq, wp, bp)

    if (Mp, Np) != (B, cfg.Out):
        out_padded = out_padded[:B, : cfg.Out]
    return out_padded


def make_classifier_forward(
    weight_t,
    bias,
    *,
    force_pallas: bool = False,
    fast_path_macs: int = 1 << 20,
    max_fullk_bytes: int = 24 * 1024 * 1024,
):
    """Build forward(x) = x @ weight_t + bias  (== nn.Linear forward).

    weight_t: (In, Out)  -- PyTorch nn.Linear weight (Out, In), pre-transposed.
    bias:     (Out,)
    Parameters are padded here, once, so the per-call path never pads them.
    """
    In, Out = weight_t.shape
    assert bias.shape == (Out,), (bias.shape, Out)
    assert weight_t.dtype == bias.dtype, (weight_t.dtype, bias.dtype)
    itemsize = jnp.dtype(weight_t.dtype).itemsize
    lane_align = _detect_lane_align()

    # ---- N tiling (batch-independent) --------------------------------------
    if Out >= lane_align and Out % lane_align == 0:
        tn = lane_align
        for cand in (512, 256, 128):
            if lane_align <= cand <= Out and Out % cand == 0:
                tn = cand
                break
        Np = Out
    elif Out <= 1024:
        # Small / unaligned head: full-N block, masked stores, no pad + slice.
        tn, Np = Out, Out
    else:
        tn = 2 * lane_align
        Np = _round_up(Out, tn)

    # ---- K handling (batch-independent; budget assumes worst-case tm) ------
    tm_budget = 512
    fullk_bytes = (
        2 * itemsize * (tm_budget * In + In * tn)  # x + w blocks, double-buffered
        + 2 * itemsize * tm_budget * tn            # output block, double-buffered
        + 2 * itemsize * tn                        # bias block
    )
    if fullk_bytes <= max_fullk_bytes:
        full_k, tk, Kp = True, In, In
    else:
        full_k = False
        tk = 0
        for cand in (512, 256, 128):
            if In % cand == 0:
                tk = cand
                break
        if tk:
            Kp = In
        else:
            # TODO(synk): rare unaligned-K fallback pads x along K per call.
            tk = 2 * lane_align
            Kp = _round_up(In, tk)

    cfg = _Config(In=In, Out=Out, Kp=Kp, Np=Np, tn=tn, tk=tk, full_k=full_k)

    # ---- one-time parameter padding (no per-call jnp.pad of the weight) ----
    wp = weight_t
    if (Kp, Np) != (In, Out):
        wp = jnp.pad(weight_t, ((0, Kp - In), (0, Np - Out)))
    bp = bias.reshape(1, Out)
    if Np != Out:
        bp = jnp.pad(bp, ((0, 0), (0, Np - Out)))

    pallas_fwd = jax.jit(functools.partial(_pallas_linear, cfg=cfg))

    @jax.jit
    def fast_fwd(x, w, b):
        acc = jnp.dot(x, w, preferred_element_type=jnp.float32)
        return (acc + b.astype(jnp.float32)).astype(x.dtype)

    def forward(x):
        assert x.ndim == 2 and x.shape[1] == In, x.shape
        assert x.dtype == weight_t.dtype, (x.dtype, weight_t.dtype)
        if (not force_pallas) and x.shape[0] * In * Out <= fast_path_macs:
            # Tiny problem: a Pallas call would be 100% launch/pad overhead.
            return fast_fwd(x, weight_t, bias)
        return pallas_fwd(x, wp, bp)

    return forward


if __name__ == "__main__":
    # Shapes implied by the module: batch=2, in_features=32, out_features=16.
    B, IN_FEATURES, OUT_FEATURES = 2, 32, 16

    key = jax.random.PRNGKey(0)
    kx, kw, kb = jax.random.split(key, 3)

    x = jax.random.normal(kx, (B, IN_FEATURES), dtype=jnp.float32)

    # PyTorch stores weight as (out, in); we keep it pre-transposed as (in, out).
    bound = 1.0 / (IN_FEATURES ** 0.5)
    weight_t = jax.random.uniform(
        kw, (IN_FEATURES, OUT_FEATURES), dtype=jnp.float32, minval=-bound, maxval=bound
    )
    bias = jax.random.uniform(
        kb, (OUT_FEATURES,), dtype=jnp.float32, minval=-bound, maxval=bound
    )
    ref = x @ weight_t + bias

    # 1) Pallas path forced (exercises the full-K kernel; no padding at all).
    fwd_pallas = make_classifier_forward(weight_t, bias, force_pallas=True)
    out = jax.block_until_ready(fwd_pallas(x))
    assert out.shape == (B, OUT_FEATURES)
    assert jnp.allclose(out, ref, atol=1e-5, rtol=1e-5)

    # 2) Default path: tiny problem takes the XLA fast path (per perf review).
    fwd_default = make_classifier_forward(weight_t, bias)
    out2 = jax.block_until_ready(fwd_default(x))
    assert jnp.allclose(out2, ref, atol=1e-5, rtol=1e-5)

    # 3) Moderate case that exercises the K-tiled accumulator kernel
    #    (max_fullk_bytes forced small so the reduction grid axis is used).
    B2, IN2, OUT2 = 48, 768, 384
    k2 = jax.random.PRNGKey(1)
    kx2, kw2, kb2 = jax.random.split(k2, 3)
    x2 = jax.random.normal(kx2, (B2, IN2), dtype=jnp.float32)
    w2 = jax.random.normal(kw2, (IN2, OUT2), dtype=jnp.float32) * 0.05
    b2 = jax.random.normal(kb2, (OUT2,), dtype=jnp.float32)
    fwd2 = make_classifier_forward(w2, b2, force_pallas=True, max_fullk_bytes=64 * 1024)
    out3 = jax.block_until_ready(fwd2(x2))
    ref3 = x2 @ w2 + b2
    assert out3.shape == (B2, OUT2)
    assert jnp.allclose(out3, ref3, atol=2e-2, rtol=2e-2)

    print("KERNEL_OK")
</pallas_src>

<mosaic_0001>
module attributes {stable_mosaic.version = 11 : i64} {
  func.func @_linear_fullk_kernel(%arg0: i32, %arg1: i32, %arg2: memref<2x32xf32, #tpu.memory_space<vmem>>, %arg3: memref<32x16xf32, #tpu.memory_space<vmem>>, %arg4: memref<1x16xf32, #tpu.memory_space<vmem>>, %arg5: memref<2x16xf32, #tpu.memory_space<vmem>>) attributes {dimension_semantics = [#tpu.dimension_semantics<parallel>, #tpu.dimension_semantics<parallel>], iteration_bounds = array<i64: 1, 1>, scalar_prefetch = 0 : i64, scratch_operands = 0 : i64, tpu.core_type = #tpu.core_type<tc>, window_params = [{transform_indices = @transform_0, window_bounds = array<i64: 2, 32>}, {transform_indices = @transform_1, window_bounds = array<i64: 32, 16>}, {transform_indices = @transform_2, window_bounds = array<i64: 1, 16>}, {transform_indices = @transform_3, window_bounds = array<i64: 2, 16>}]} {
    %c0 = arith.constant 0 : index
    %c0_0 = arith.constant 0 : index
    %0 = vector.load %arg2[%c0, %c0_0] : memref<2x32xf32, #tpu.memory_space<vmem>>, vector<2x32xf32>
    %c0_1 = arith.constant 0 : index
    %c0_2 = arith.constant 0 : index
    %1 = vector.load %arg3[%c0_1, %c0_2] : memref<32x16xf32, #tpu.memory_space<vmem>>, vector<32x16xf32>
    %cst = arith.constant dense<0.000000e+00> : vector<2x16xf32>
    %2 = tpu.matmul %0, %1, %cst {dimension_numbers = #tpu.dot_dimension_numbers<[1], [0], [0], [1], [0, 0, 1, 1], [], []>} : vector<2x32xf32>, vector<32x16xf32>, vector<2x16xf32> -> vector<2x16xf32>
    %c0_3 = arith.constant 0 : index
    %c0_4 = arith.constant 0 : index
    %3 = vector.load %arg4[%c0_3, %c0_4] : memref<1x16xf32, #tpu.memory_space<vmem>>, vector<1x16xf32>
    %4 = vector.broadcast %3 : vector<1x16xf32> to vector<2x16xf32>
    %5 = arith.addf %2, %4 : vector<2x16xf32>
    %c0_5 = arith.constant 0 : index
    %c0_6 = arith.constant 0 : index
    %6 = vector.load %arg5[%c0_5, %c0_6] : memref<2x16xf32, #tpu.memory_space<vmem>>, vector<2x16xf32>
    tpu.vector_store %arg5[%c0_5, %c0_6], %5 {strides = array<i32>} : memref<2x16xf32, #tpu.memory_space<vmem>>, vector<2x16xf32>,
    return
  }
  func.func @transform_0(%arg0: i32, %arg1: i32) -> (i32, i32) {
    %c0_i32 = arith.constant 0 : i32
    %c0_i32_0 = arith.constant 0 : i32
    return %arg0, %c0_i32 : i32, i32
  }
  func.func @transform_1(%arg0: i32, %arg1: i32) -> (i32, i32) {
    %c0_i32 = arith.constant 0 : i32
    %c0_i32_0 = arith.constant 0 : i32
    return %c0_i32, %arg1 : i32, i32
  }
  func.func @transform_2(%arg0: i32, %arg1: i32) -> (i32, i32) {
    %c0_i32 = arith.constant 0 : i32
    %c0_i32_0 = arith.constant 0 : i32
    return %c0_i32, %arg1 : i32, i32
  }
  func.func @transform_3(%arg0: i32, %arg1: i32) -> (i32, i32) {
    %c0_i32 = arith.constant 0 : i32
    return %arg0, %arg1 : i32, i32
  }
}

</mosaic_0001>

<bundles_post_ra>
// kernel: _pallas_linear.1
= control target key start
LH: loop header
LB: loop body
LE: loop exit
PB: predicated region body
PF: predicated region fallthrough
CT: control target
= control target key end

     0   :  { %v160_v1 = vmov 0.0   ;;  %vm161_vm0 = vmmov 0   ;;  %s204_s0 = inlined_call_operand.vmem [shape: f32[2,32], index: 0, kind: input, shape index: {}]   ;;  %s205_s1 = inlined_call_operand.vmem [shape: f32[32,16], index: 1, kind: input, shape index: {}]   ;;  %s206_s2 = inlined_call_operand.vmem [shape: f32[1,16], index: 2, kind: input, shape index: {}]   ;;  %s207_s3 = inlined_call_operand.hbm [shape: f32[2,16], index: 3, kind: output, shape index: {}]  }
   0x1   :  { %v19_v0 = vld [vmem:[%s205_s1 + $0x18] sm:$0xff]  ;;  %124 = vmatprep.subr.mxu0 %v160_v1  ;;  %v18_v2 = vld [vmem:[%s205_s1 + $0x10] sm:$0xff]  ;;  %132 = vmatprep.mubr.msk.f32.mxu0 %vm161_vm0, %v160_v1 }
   0x2   :  { %125 = vmatpush3.msra.mxu0 %v19_v0 }
   0x3   :  { %8 = vsyncpa [#allocation3], 0  ;;  %126 = vmatprep.subr.mxu0 %v160_v1  ;;  %v17_v3 = vld [vmem:[%s205_s1 + $0x8] sm:$0xff]  ;;  %v16_v4 = vld [vmem:[%s205_s1] sm:$0xff]  ;;  %vm27_vm1 = vcmask 261120   ;;  %s162_s24 = smov [#allocation2]  }
   0x4   :  { %127 = vmatpush3.msra.mxu0 %v18_v2  ;;  %v15_v5 = vld [vmem:[%s204_s0] sm:$0x3]  ;;  %s109_s25 = sshll.u32 %s162_s24, 4  ;;  %vm101_vm2 = vcmask 123904   ;;  %s110_s25 = int_to_ptr.vmem [resolvable:$true] %s109_s25 }
   0x5   :  { %128 = vmatprep.subr.mxu0 %v160_v1  ;;  %v117_v6 = vld [vmem:[%s206_s2] ss:$0 sm:$0xff]  ;;  %s138_s1 = scalar_lea.vmem %s110_s25, 32  ;;  %p143_p1 = scmp.lt.s32.totalorder %s110_s25, %s110_s25 }
   0x6   :  { %129 = vmatpush3.msra.mxu0 %v17_v3  ;;  %p139_p0 = scmp.ne.s32.totalorder %s110_s25, %s138_s1  ;;  %p144_p2 = scmp.lt.s32.totalorder %s138_s1, %s138_s1 }
   0x7   :  { %130 = vmatprep.subr.mxu0 %v160_v1 }
   0x8   :  { %131 = vmatpush3.msra.mxu0 %v16_v4  ;;  %p145_p3 = por %p144_p2, %p143_p1 }
   0x9   :  { %133 = vmatmul.mubr.msk.f32.vlgmr.msra.gmra.mxu0 %vm27_vm1, %v15_v5 }
   0xa   :  { %p146_p4 = pnand %p145_p3, %p139_p0 }
  0xc9   :  { %v97_v7 = vpop.f32.mrf.mxu0 }
  0xca   :  { %v98_v8 = vadd.f32 %v117_v6, %v97_v7 }
  0xcb   :  { %v134_v9 = vpop.f32.mrf.mxu0 }
  0xcc   :  { %102 = vst.msk [vmem:[#allocation2] sm:$0x3] %vm101_vm2, %v98_v8 }
  0xcd   :  { %149 = shalt.err (!%p146_p4)
}
  0xce   :  { %112 = dma.vmem_to_hbm [thread:$0]  %s110_s25, 32, %s207_s3, [#allocation3]  }
  0xcf   :  { %158 = dma.done.wait [#allocation3], 32  }
  0xd0   :  { %159 = vsyncadd [#allocation3], 4294967264 }
  0xd1   :  { %116 = vsyncpa [#allocation3], 1 }

</bundles_post_ra>
